<compile_context>
chip_gen: v6e
topology: v6e:2x2x1
jax: 0.10.0
libtpu: 0.0.40
codegen_flags: <defaults>
</compile_context>

<pallas_src>
import jax
import jax.numpy as jnp
from jax.experimental import pallas as pl
from jax.experimental.pallas import tpu as pltpu


def _round_up(n, m):
    return ((n + m - 1) // m) * m


def _mlp_kernel(x_ref, w1_ref, b1_ref, w2_ref, b2_ref, w3_ref, b3_ref, o_ref):
    cd = w1_ref.dtype                              # MXU operand dtype (bf16 by default)

    x = x_ref[...].astype(cd)                      # (TB, D)
    h1 = jnp.dot(x, w1_ref[...],
                 preferred_element_type=jnp.float32) + b1_ref[...]
    h1 = jnp.maximum(h1, 0.0)                      # ReLU on VPU, f32
    h2 = jnp.dot(h1.astype(cd), w2_ref[...],
                 preferred_element_type=jnp.float32) + b2_ref[...]
    h2 = jnp.maximum(h2, 0.0)                      # (TB, H2) f32

    # Final Linear(H2, 1) as (1,H2) @ (TB,H2)^T -> (1,TB): lane-dense result,
    # one small MXU op instead of a lane-sparse (TB,1) column of masked stores.
    out = jax.lax.dot_general(
        w3_ref[...], h2,
        dimension_numbers=(((1,), (1,)), ((), ())),
        preferred_element_type=jnp.float32) + b3_ref[...]
    o_ref[...] = out.astype(o_ref.dtype)


def body_fat_nn_forward(x, params, *, block_batch=16384,
                        compute_dtype=jnp.bfloat16):
    """Fused MLP forward. x: (B, input_dim). params: dict of weights/biases."""
    assert x.ndim == 2
    w1, b1, w2, b2, w3, b3 = (params["w1"], params["b1"], params["w2"],
                              params["b2"], params["w3"], params["b3"])
    B, D = x.shape
    H1, H2 = w1.shape[1], w2.shape[1]

    # Layer-1/2 weights in compute dtype for the MXU; everything else f32.
    w1c = w1.astype(compute_dtype)
    w2c = w2.astype(compute_dtype)
    b1f = b1.reshape(1, H1).astype(jnp.float32)
    b2f = b2.reshape(1, H2).astype(jnp.float32)
    w3_row = w3.reshape(1, H2).astype(jnp.float32)   # (1, H2) for the final layer
    b3f = b3.reshape(1, 1).astype(jnp.float32)

    # Batch tile: multiple of 8 (sublane), large enough to amortize per-step
    # overhead.  No jnp.pad copy of x: grid = cdiv(B, TB), ragged last tile OK.
    B8 = _round_up(B, 8)
    TB = min(block_batch, B8)
    if TB == B8 and B8 >= 4096:
        # v7x megacore: guarantee >=2 tiles so both TensorCores get work.
        TB = _round_up(pl.cdiv(B8, 2), 128)
    num_tiles = pl.cdiv(B, TB)

    def resident(a):                                  # VMEM-resident weight/bias
        return pl.BlockSpec(a.shape, lambda i: (0,) * a.ndim)

    flops = 2 * B * (D * H1 + H1 * H2 + H2)
    bytes_accessed = (x.size * x.dtype.itemsize + B * 4 +
                      sum(int(a.size) * a.dtype.itemsize
                          for a in (w1c, b1f, w2c, b2f, w3_row, b3f)))

    out = pl.pallas_call(
        _mlp_kernel,
        out_shape=jax.ShapeDtypeStruct((num_tiles, TB), jnp.float32),
        grid=(num_tiles,),
        in_specs=[
            # x tile, pipelined HBM->VMEM.
            # TODO(synk): if profiling shows the x DMA still exposed, add
            # pipeline_mode=pl.Buffered(3) here.
            pl.BlockSpec((TB, D), lambda i: (i, 0)),
            resident(w1c), resident(b1f),
            resident(w2c), resident(b2f),
            resident(w3_row), resident(b3f),
        ],
        out_specs=pl.BlockSpec((1, TB), lambda i: (i, 0)),   # lane-dense rows
        compiler_params=pltpu.CompilerParams(
            dimension_semantics=("parallel",),   # shard tiles across TCs (v7x)
            vmem_limit_bytes=40 << 20,           # explicit (v5e default is 16 MiB)
        ),
        cost_estimate=pl.CostEstimate(
            flops=flops, transcendentals=0, bytes_accessed=bytes_accessed),
    )(x, w1c, b1f, w2c, b2f, w3_row, b3f)

    # (num_tiles, TB) row-major is exactly batch order; drop the ragged tail.
    return out.reshape(num_tiles * TB, 1)[:B]


def init_params(input_dim, key):
    """Deterministic synthetic init (shapes match BodyFatNN.__init__)."""
    ks = jax.random.split(key, 6)

    def lin(kw, kb, fan_in, fan_out):
        bound = 1.0 / jnp.sqrt(fan_in)
        w = jax.random.uniform(kw, (fan_in, fan_out), jnp.float32, -bound, bound)
        b = jax.random.uniform(kb, (1, fan_out), jnp.float32, -bound, bound)
        return w, b

    w1, b1 = lin(ks[0], ks[1], input_dim, 64)
    w2, b2 = lin(ks[2], ks[3], 64, 32)
    w3, b3 = lin(ks[4], ks[5], 32, 1)
    return {"w1": w1, "b1": b1, "w2": w2, "b2": b2, "w3": w3, "b3": b3}


def _reference_forward(x, p, compute_dtype=jnp.float32):
    """Reference matching the kernel numerics: layers 1-2 in compute_dtype with
    f32 accumulation, final layer in f32."""
    cd = compute_dtype
    prec = jax.lax.Precision.HIGHEST if cd == jnp.float32 else None

    def mm(a, w):
        return jnp.dot(a.astype(cd), w.astype(cd),
                       preferred_element_type=jnp.float32, precision=prec)

    h = jnp.maximum(mm(x, p["w1"]) + p["b1"], 0.0)
    h = jnp.maximum(mm(h, p["w2"]) + p["b2"], 0.0)
    return jnp.dot(h, p["w3"], preferred_element_type=jnp.float32,
                   precision=jax.lax.Precision.HIGHEST) + p["b3"]


if __name__ == "__main__":
    key = jax.random.PRNGKey(0)
    k_x, k_p = jax.random.split(key)

    batch, input_dim = 8, 16
    x = jax.random.normal(k_x, (batch, input_dim), jnp.float32)
    params = init_params(input_dim, k_p)

    ref_f32 = _reference_forward(x, params)

    # f32 compute path: should track the f32 reference closely.
    out_f32 = jax.block_until_ready(
        body_fat_nn_forward(x, params, compute_dtype=jnp.float32))
    assert out_f32.shape == (batch, 1), out_f32.shape
    assert jnp.allclose(out_f32, ref_f32, atol=1e-3, rtol=1e-3), \
        f"f32 path max abs err {jnp.max(jnp.abs(out_f32 - ref_f32))}"

    # Default bf16-matmul path: check against a precision-matched reference and
    # (loosely) against the pure f32 reference.
    out_bf = jax.block_until_ready(body_fat_nn_forward(x, params))
    ref_bf = _reference_forward(x, params, compute_dtype=jnp.bfloat16)
    assert out_bf.shape == (batch, 1), out_bf.shape
    assert jnp.allclose(out_bf, ref_bf, atol=1e-3, rtol=1e-3), \
        f"bf16 path max abs err vs matched ref {jnp.max(jnp.abs(out_bf - ref_bf))}"
    assert jnp.allclose(out_bf, ref_f32, atol=5e-2, rtol=5e-2), \
        f"bf16 path max abs err vs f32 ref {jnp.max(jnp.abs(out_bf - ref_f32))}"

    # Larger ragged batch: exercises the megacore tile split, multiple grid
    # steps and the ragged (non-padded) last tile.
    big_batch = 8192 + 100
    xb = jax.random.normal(k_x, (big_batch, input_dim), jnp.float32)
    ob = jax.block_until_ready(body_fat_nn_forward(xb, params))
    rb = _reference_forward(xb, params, compute_dtype=jnp.bfloat16)
    assert ob.shape == (big_batch, 1), ob.shape
    assert jnp.allclose(ob, rb, atol=1e-3, rtol=1e-3), \
        f"big batch max abs err {jnp.max(jnp.abs(ob - rb))}"

    print("KERNEL_OK")
</pallas_src>

<mosaic_0001>
module attributes {stable_mosaic.version = 11 : i64} {
  func.func @_mlp_kernel(%arg0: i32, %arg1: memref<8x16xf32, #tpu.memory_space<vmem>>, %arg2: memref<16x64xf32, #tpu.memory_space<vmem>>, %arg3: memref<1x64xf32, #tpu.memory_space<vmem>>, %arg4: memref<64x32xf32, #tpu.memory_space<vmem>>, %arg5: memref<1x32xf32, #tpu.memory_space<vmem>>, %arg6: memref<1x32xf32, #tpu.memory_space<vmem>>, %arg7: memref<1x1xf32, #tpu.memory_space<vmem>>, %arg8: memref<1x8xf32, #tpu.memory_space<vmem>>) attributes {dimension_semantics = [#tpu.dimension_semantics<parallel>], iteration_bounds = array<i64: 1>, scalar_prefetch = 0 : i64, scratch_operands = 0 : i64, tpu.core_type = #tpu.core_type<tc>, window_params = [{transform_indices = @transform_0, window_bounds = array<i64: 8, 16>}, {pipeline_mode = #tpu.pipeline_mode<synchronous>, transform_indices = @transform_1, window_bounds = array<i64: 16, 64>}, {pipeline_mode = #tpu.pipeline_mode<synchronous>, transform_indices = @transform_2, window_bounds = array<i64: 1, 64>}, {pipeline_mode = #tpu.pipeline_mode<synchronous>, transform_indices = @transform_3, window_bounds = array<i64: 64, 32>}, {pipeline_mode = #tpu.pipeline_mode<synchronous>, transform_indices = @transform_4, window_bounds = array<i64: 1, 32>}, {pipeline_mode = #tpu.pipeline_mode<synchronous>, transform_indices = @transform_5, window_bounds = array<i64: 1, 32>}, {pipeline_mode = #tpu.pipeline_mode<synchronous>, transform_indices = @transform_6, window_bounds = array<i64: 1, 1>}, {transform_indices = @transform_7, window_bounds = array<i64: 1, 8>}]} {
    %c0 = arith.constant 0 : index
    %c0_0 = arith.constant 0 : index
    %0 = vector.load %arg1[%c0, %c0_0] : memref<8x16xf32, #tpu.memory_space<vmem>>, vector<8x16xf32>
    %c0_1 = arith.constant 0 : index
    %c0_2 = arith.constant 0 : index
    %1 = vector.load %arg2[%c0_1, %c0_2] : memref<16x64xf32, #tpu.memory_space<vmem>>, vector<16x64xf32>
    %cst = arith.constant dense<0.000000e+00> : vector<8x64xf32>
    %2 = tpu.matmul %0, %1, %cst {dimension_numbers = #tpu.dot_dimension_numbers<[1], [0], [0], [1], [0, 0, 1, 1], [], []>} : vector<8x16xf32>, vector<16x64xf32>, vector<8x64xf32> -> vector<8x64xf32>
    %c0_3 = arith.constant 0 : index
    %c0_4 = arith.constant 0 : index
    %3 = vector.load %arg3[%c0_3, %c0_4] : memref<1x64xf32, #tpu.memory_space<vmem>>, vector<1x64xf32>
    %4 = vector.broadcast %3 : vector<1x64xf32> to vector<8x64xf32>
    %5 = arith.addf %2, %4 : vector<8x64xf32>
    %cst_5 = arith.constant 0.000000e+00 : f32
    %6 = vector.broadcast %cst_5 : f32 to vector<8x64xf32>
    %7 = arith.maximumf %5, %6 : vector<8x64xf32>
    %c0_6 = arith.constant 0 : index
    %c0_7 = arith.constant 0 : index
    %8 = vector.load %arg4[%c0_6, %c0_7] : memref<64x32xf32, #tpu.memory_space<vmem>>, vector<64x32xf32>
    %cst_8 = arith.constant dense<0.000000e+00> : vector<8x32xf32>
    %9 = tpu.matmul %7, %8, %cst_8 {dimension_numbers = #tpu.dot_dimension_numbers<[1], [0], [0], [1], [0, 0, 1, 1], [], []>} : vector<8x64xf32>, vector<64x32xf32>, vector<8x32xf32> -> vector<8x32xf32>
    %c0_9 = arith.constant 0 : index
    %c0_10 = arith.constant 0 : index
    %10 = vector.load %arg5[%c0_9, %c0_10] : memref<1x32xf32, #tpu.memory_space<vmem>>, vector<1x32xf32>
    %11 = vector.broadcast %10 : vector<1x32xf32> to vector<8x32xf32>
    %12 = arith.addf %9, %11 : vector<8x32xf32>
    %cst_11 = arith.constant 0.000000e+00 : f32
    %13 = vector.broadcast %cst_11 : f32 to vector<8x32xf32>
    %14 = arith.maximumf %12, %13 : vector<8x32xf32>
    %c0_12 = arith.constant 0 : index
    %c0_13 = arith.constant 0 : index
    %15 = vector.load %arg6[%c0_12, %c0_13] : memref<1x32xf32, #tpu.memory_space<vmem>>, vector<1x32xf32>
    %cst_14 = arith.constant dense<0.000000e+00> : vector<1x8xf32>
    %16 = tpu.matmul %15, %14, %cst_14 {dimension_numbers = #tpu.dot_dimension_numbers<[1], [1], [0], [0], [0, 0, 1, 0], [], []>} : vector<1x32xf32>, vector<8x32xf32>, vector<1x8xf32> -> vector<1x8xf32>
    %c0_15 = arith.constant 0 : index
    %c0_16 = arith.constant 0 : index
    %17 = vector.load %arg7[%c0_15, %c0_16] : memref<1x1xf32, #tpu.memory_space<vmem>>, vector<1x1xf32>
    %18 = vector.broadcast %17 : vector<1x1xf32> to vector<1x8xf32>
    %19 = arith.addf %16, %18 : vector<1x8xf32>
    %c0_17 = arith.constant 0 : index
    %c0_18 = arith.constant 0 : index
    %20 = vector.load %arg8[%c0_17, %c0_18] : memref<1x8xf32, #tpu.memory_space<vmem>>, vector<1x8xf32>
    tpu.vector_store %arg8[%c0_17, %c0_18], %19 {strides = array<i32>} : memref<1x8xf32, #tpu.memory_space<vmem>>, vector<1x8xf32>,
    return
  }
  func.func @transform_0(%arg0: i32) -> (i32, i32) {
    %c0_i32 = arith.constant 0 : i32
    %c0_i32_0 = arith.constant 0 : i32
    return %arg0, %c0_i32 : i32, i32
  }
  func.func @transform_1(%arg0: i32) -> (i32, i32) {
    %c0_i32 = arith.constant 0 : i32
    %c0_i32_0 = arith.constant 0 : i32
    %c0_i32_1 = arith.constant 0 : i32
    return %c0_i32, %c0_i32_0 : i32, i32
  }
  func.func @transform_2(%arg0: i32) -> (i32, i32) {
    %c0_i32 = arith.constant 0 : i32
    %c0_i32_0 = arith.constant 0 : i32
    %c0_i32_1 = arith.constant 0 : i32
    return %c0_i32, %c0_i32_0 : i32, i32
  }
  func.func @transform_3(%arg0: i32) -> (i32, i32) {
    %c0_i32 = arith.constant 0 : i32
    %c0_i32_0 = arith.constant 0 : i32
    %c0_i32_1 = arith.constant 0 : i32
    return %c0_i32, %c0_i32_0 : i32, i32
  }
  func.func @transform_4(%arg0: i32) -> (i32, i32) {
    %c0_i32 = arith.constant 0 : i32
    %c0_i32_0 = arith.constant 0 : i32
    %c0_i32_1 = arith.constant 0 : i32
    return %c0_i32, %c0_i32_0 : i32, i32
  }
  func.func @transform_5(%arg0: i32) -> (i32, i32) {
    %c0_i32 = arith.constant 0 : i32
    %c0_i32_0 = arith.constant 0 : i32
    %c0_i32_1 = arith.constant 0 : i32
    return %c0_i32, %c0_i32_0 : i32, i32
  }
  func.func @transform_6(%arg0: i32) -> (i32, i32) {
    %c0_i32 = arith.constant 0 : i32
    %c0_i32_0 = arith.constant 0 : i32
    %c0_i32_1 = arith.constant 0 : i32
    return %c0_i32, %c0_i32_0 : i32, i32
  }
  func.func @transform_7(%arg0: i32) -> (i32, i32) {
    %c0_i32 = arith.constant 0 : i32
    %c0_i32_0 = arith.constant 0 : i32
    return %arg0, %c0_i32 : i32, i32
  }
}

</mosaic_0001>

<bundles_post_ra>
// kernel: tpu_custom_call.1
= control target key start
LH: loop header
LB: loop body
LE: loop exit
PB: predicated region body
PF: predicated region fallthrough
CT: control target
= control target key end

     0   :  { %s481_s0 = inlined_call_operand.vmem [shape: f32[8,16], index: 0, kind: input, shape index: {}]   ;;  %s482_s1 = inlined_call_operand.vmem [shape: f32[16,64], index: 1, kind: input, shape index: {}]   ;;  %s483_s2 = inlined_call_operand.vmem [shape: f32[1,64], index: 2, kind: input, shape index: {}]   ;;  %s484_s3 = inlined_call_operand.vmem [shape: f32[64,32], index: 3, kind: input, shape index: {}]   ;;  %s485_s4 = inlined_call_operand.vmem [shape: f32[1,32], index: 4, kind: input, shape index: {}]   ;;  %s486_s5 = inlined_call_operand.vmem [shape: f32[1,32], index: 5, kind: input, shape index: {}]   ;;  %s487_s6 = inlined_call_operand.<no memory space> [shape: f32[1,1], index: 6, kind: input, shape index: {}]   ;;  %s488_s7 = inlined_call_operand.hbm [shape: f32[1,8], index: 7, kind: output, shape index: {}]  }
   0x1   :  { %v12_v0 = vstv %s487_s6 }
   0x2   :  { %13 = vst [vmem:[#allocation2] sm:$0x1] %v12_v0 }
   0x3   :  { %v31_v1 = vld [vmem:[%s482_s1 + $0x8] sm:$0xff]  ;;  %v386_v2 = vmov 0.0   ;;  %v30_v3 = vld [vmem:[%s482_s1] sm:$0xff]  ;;  %vm387_vm0 = vmmov 0   ;;  %v121_v4 = vld [vmem:[%s484_s3 + $0x38] sm:$0xff]  ;;  %vm39_vm1 = vcmask 130048  }
   0x4   :  { %328 = vmatprep.subr.mxu0 %v386_v2  ;;  %332 = vmatprep.mubr.msk.f32.mxu0 %vm387_vm0, %v386_v2  ;;  %v29_v5 = vld [vmem:[%s481_s0] sm:$0xff]  ;;  %v120_v6 = vld [vmem:[%s484_s3 + $0x30] sm:$0xff] }
   0x5   :  { %329 = vmatpush3.msra.mxu0 %v31_v1  ;;  %335 = vmatprep.subr.mxu1 %v386_v2 }
   0x6   :  { %330 = vmatprep.subr.mxu0 %v386_v2  ;;  %336 = vmatpush3.msra.mxu1 %v121_v4 }
   0x7   :  { %14 = vsyncpa [#allocation4], 0  ;;  %331 = vmatpush3.msra.mxu0 %v30_v3  ;;  %337 = vmatprep.subr.mxu1 %v386_v2  ;;  %v119_v7 = vld [vmem:[%s484_s3 + $0x28] sm:$0xff]  ;;  %v118_v8 = vld [vmem:[%s484_s3 + $0x20] sm:$0xff]  ;;  %vm129_vm2 = vcmask 523264   ;;  %v388_v19 = vmov 0   ;;  %v211_v26 = vlaneseq }
   0x8   :  { %333 = vmatmul.mubr.msk.f32.vlgmr.msra.gmra.mxu0 %vm39_vm1, %v29_v5  ;;  %338 = vmatpush3.msra.mxu1 %v120_v6  ;;  %v117_v9 = vld [vmem:[%s484_s3 + $0x18] sm:$0xff]  ;;  %v116_v10 = vld [vmem:[%s484_s3 + $0x10] sm:$0xff]  ;;  %v115_v11 = vld [vmem:[%s484_s3 + $0x8] sm:$0xff]  ;;  %vm215_vm3 = vcmask 261120   ;;  %s389_s26 = smov [#allocation3]   ;;  %vm292_vm4 = vcmask 57344  }
   0x9   :  { %339 = vmatprep.subr.mxu1 %v386_v2  ;;  %351 = vmatprep.mubr.msk.f32.mxu1 %vm387_vm0, %v386_v2  ;;  %v114_v12 = vld [vmem:[%s484_s3] sm:$0xff]  ;;  %v212_v27 = vshrl.u32 %v211_v26, 7  ;;  %s300_s27 = sshll.u32 %s389_s26, 4  ;;  %s301_s27 = int_to_ptr.vmem [resolvable:$true] %s300_s27 }
   0xa   :  { %340 = vmatpush3.msra.mxu1 %v119_v7  ;;  %354 = vmatprep.subr.mxu0 %v386_v2  ;;  %v308_v13 = vld [vmem:[%s483_s2] ss:$0 sm:$0xff]  ;;  %s368_s28 = scalar_lea.vmem %s301_s27, 32  ;;  %p369_p1 = scmp.lt.s32.totalorder %s301_s27, %s301_s27 }
   0xb   :  { %341 = vmatprep.subr.mxu1 %v386_v2  ;;  %356 = vmatprep.mubr.msk.f32.mxu0 %vm387_vm0, %v386_v2  ;;  %v205_v18 = vld [vmem:[#allocation2] sm:$0x1]  ;;  %v213_v28 = vsub.s32 0, %v212_v27 }
   0xc   :  { %342 = vmatpush3.msra.mxu1 %v118_v8  ;;  %363 = vset.pattern.permute.xlu0 %v388_v19  ;;  %v310_v20 = vld [vmem:[%s485_s4] ss:$0 sm:$0xff]  ;;  %s364_s4 = scalar_lea.vmem %s301_s27, 16 }
   0xd   :  { %343 = vmatprep.subr.mxu1 %v386_v2  ;;  %208 = vperm.xlu0 %363, %v205_v18   ;;  %v204_v25 = vld [vmem:[%s486_s5] sm:$0x1]  ;;  %p365_p0 = scmp.ne.s32.totalorder %s301_s27, %s364_s4  ;;  %p370_p2 = scmp.lt.s32.totalorder %s368_s28, %s364_s4 }
   0xe   :  { %344 = vmatpush3.msra.mxu1 %v117_v9 }
   0xf   :  { %345 = vmatprep.subr.mxu1 %v386_v2  ;;  %p371_p3 = por %p370_p2, %p369_p1 }
  0x10   :  { %346 = vmatpush3.msra.mxu1 %v116_v10 }
  0x11   :  { %347 = vmatprep.subr.mxu1 %v386_v2  ;;  %p372_p4 = pnand %p371_p3, %p365_p0 }
  0x12   :  { %348 = vmatpush3.msra.mxu1 %v115_v11 }
  0x13   :  { %349 = vmatprep.subr.mxu1 %v386_v2 }
  0x14   :  { %350 = vmatpush3.msra.mxu1 %v114_v12 }
  0x88   :  { %v209_v29 = vpop.permute.xlu0 %208 }
  0x89   :  { %v214_v30 = vrot.slane %v209_v29, %v213_v28 }
  0xc8   :  { %v109_v14 = vpop.f32.mrf.mxu0 }
  0xc9   :  { %v110_v15 = vadd.f32 %v308_v13, %v109_v14 }
  0xca   :  { %v334_v16 = vpop.f32.mrf.mxu0 }
  0xcb   :  { %v113_v17 = vmax.f32 %v110_v15, 0.0 }
  0xcd   :  { %352 = vmatmul.mubr.msk.f32.vlgmr.msra.gmra.mxu1 %vm129_vm2, %v113_v17 }
 0x18d   :  { %v199_v21 = vpop.f32.mrf.mxu1 }
 0x18e   :  { %v200_v22 = vadd.f32 %v310_v20, %v199_v21 }
 0x18f   :  { %v353_v23 = vpop.f32.mrf.mxu1 }
 0x190   :  { %v203_v24 = vmax.f32 %v200_v22, 0.0 }
 0x192   :  { %355 = vmatpush3.xpose.msk.msra.mxu0 %vm215_vm3, %v203_v24 }
 0x195   :  { %357 = vmatmul.mubr.msk.f32.vlgmr.msra.gmra.mxu0 %vm215_vm3, %v204_v25 }
 0x255   :  { %v288_v31 = vpop.f32.mrf.mxu0 }
 0x256   :  { %v289_v32 = vadd.f32 %v288_v31, %v214_v30 }
 0x257   :  { %v358_v33 = vpop.f32.mrf.mxu0 }
 0x258   :  { %293 = vst.msk [vmem:[#allocation3] sm:$0x1] %vm292_vm4, %v289_v32 }
 0x259   :  { %375 = shalt.err (!%p372_p4)
}
 0x25a   :  { %303 = dma.vmem_to_hbm [thread:$0]  %s301_s27, 16, %s488_s7, [#allocation4]  }
 0x25b   :  { %384 = dma.done.wait [#allocation4], 16  }
 0x25c   :  { %385 = vsyncadd [#allocation4], 4294967280 }
 0x25d   :  { %307 = vsyncpa [#allocation4], 1 }

</bundles_post_ra>
